<compile_context>
chip_gen: v5e
topology: v5e:2x2
jax: 0.10.0
libtpu: 0.0.40
codegen_flags: <defaults>
</compile_context>

<pallas_src>
import functools

import jax
import jax.numpy as jnp
from jax.experimental import pallas as pl
from jax.experimental.pallas import tpu as pltpu


def _round_up(x, m):
    return (x + m - 1) // m * m


def _silu_f32(x):
    # SiLU with exp + approx reciprocal; both land on the EUP slot, math in f32.
    return x * pl.reciprocal(1.0 + jnp.exp(-x), approx=True)


def encoder_kernel(xt_ref, w1_ref, b1_ref, w2_ref, b2_ref, w3_ref, b3_ref, o_ref,
                   *, compute_dtype):
    # xt tile: (D_in, block_b) with batch on the lane axis.
    xt = xt_ref[...].astype(compute_dtype)

    # Layer 1: (H1, D_in) @ (D_in, Bt) -> f32 acc -> +b -> SiLU   (lane-dense)
    h = jnp.dot(w1_ref[...], xt, preferred_element_type=jnp.float32) + b1_ref[...]
    h = _silu_f32(h)

    # Layer 2: (H2, H1) @ (H1, Bt)
    h = jnp.dot(w2_ref[...], h.astype(compute_dtype),
                preferred_element_type=jnp.float32) + b2_ref[...]
    h = _silu_f32(h)

    # Layer 3: (E, H2) @ (H2, Bt) -> lane-dense (E, Bt) store (unmasked vst).
    h = jnp.dot(w3_ref[...], h.astype(compute_dtype),
                preferred_element_type=jnp.float32) + b3_ref[...]
    o_ref[...] = _silu_f32(h).astype(o_ref.dtype)


def encoder_forward(x, params, *, block_b=4096, use_bf16=True, core_parallel=False):
    """x: (B, D_in) float32. params: dict of w1,b1,w2,b2,w3,b3 (f32).

    block_b: batch-tile width (lane axis).  Rounded to a multiple of 128.
             Sweep in the 2048-8192 range on real workloads.
    core_parallel: set True on v7x (2 TensorCores) to shard the batch axis.
    """
    B, D_in = x.shape
    H1 = params["w1"].shape[1]       # 128
    H2 = params["w2"].shape[1]       # 32
    E = params["w3"].shape[1]        # encode_size

    compute_dtype = jnp.bfloat16 if use_bf16 else jnp.float32

    # Batch tile is the lane dimension of every block: multiple of 128 lanes.
    block_b = max(128, _round_up(block_b, 128))
    block_b = min(block_b, _round_up(B, 128))
    B_pad = _round_up(B, block_b)
    grid = (B_pad // block_b,)

    # Pad batch to a tile multiple and transpose to feature-major (D_in, B_pad).
    # Padding rows produce garbage (SiLU of the bias chain) and are sliced off;
    # safe because nothing reduces over the batch axis.
    xt = jnp.pad(x, ((0, B_pad - B), (0, 0))).T

    # One-time weight cast/transpose in the wrapper; biases stay f32 columns.
    w1t = params["w1"].T.astype(compute_dtype)          # (H1, D_in)
    w2t = params["w2"].T.astype(compute_dtype)          # (H2, H1)
    w3t = params["w3"].T.astype(compute_dtype)          # (E,  H2)
    b1c = params["b1"].reshape(H1, 1).astype(jnp.float32)
    b2c = params["b2"].reshape(H2, 1).astype(jnp.float32)
    b3c = params["b3"].reshape(E, 1).astype(jnp.float32)

    # Constant index_map -> Pallas keeps these blocks resident across grid steps.
    rep = lambda shape: pl.BlockSpec(shape, lambda i: (0, 0))

    flops = 2 * B_pad * (D_in * H1 + H1 * H2 + H2 * E)
    transcendentals = B_pad * (H1 + H2 + E)              # one exp per SiLU element
    bytes_accessed = int(
        B_pad * D_in * x.dtype.itemsize
        + B_pad * E * x.dtype.itemsize
        + sum(int(a.size) * a.dtype.itemsize
              for a in (w1t, w2t, w3t, b1c, b2c, b3c))
    )

    kernel = functools.partial(encoder_kernel, compute_dtype=compute_dtype)

    dim_sem = (pltpu.CORE_PARALLEL,) if core_parallel else ("parallel",)

    out_t = pl.pallas_call(
        kernel,
        out_shape=jax.ShapeDtypeStruct((E, B_pad), x.dtype),
        grid_spec=pltpu.PrefetchScalarGridSpec(
            num_scalar_prefetch=0,
            grid=grid,
            in_specs=[
                pl.BlockSpec((D_in, block_b), lambda i: (0, i)),   # x^T tile (pipelined)
                rep((H1, D_in)),                                   # w1^T
                rep((H1, 1)),                                      # b1
                rep((H2, H1)),                                     # w2^T
                rep((H2, 1)),                                      # b2
                rep((E, H2)),                                      # w3^T
                rep((E, 1)),                                       # b3
            ],
            out_specs=pl.BlockSpec((E, block_b), lambda i: (0, i)),
        ),
        compiler_params=pltpu.CompilerParams(
            dimension_semantics=dim_sem,
            # > v5e's 16 MiB scoped default, < v7x's 64 MiB physical (headroom).
            vmem_limit_bytes=48 * 1024 * 1024,
        ),
        cost_estimate=pl.CostEstimate(
            flops=flops,
            transcendentals=transcendentals,
            bytes_accessed=bytes_accessed,
        ),
    )(xt, w1t, b1c, w2t, b2c, w3t, b3c)

    out = out_t.T                                         # (B_pad, E), tiny transpose
    return out[:B] if B_pad != B else out


def init_encoder_params(key, input_size, encode_size=16):
    """Deterministic init mirroring nn.Linear defaults (uniform +/- 1/sqrt(fan_in))."""
    dims = [(input_size, 128), (128, 32), (32, encode_size)]
    params = {}
    for idx, (fan_in, fan_out) in enumerate(dims, start=1):
        key, kw, kb = jax.random.split(key, 3)
        bound = 1.0 / (fan_in ** 0.5)
        params[f"w{idx}"] = jax.random.uniform(
            kw, (fan_in, fan_out), jnp.float32, -bound, bound)
        params[f"b{idx}"] = jax.random.uniform(
            kb, (1, fan_out), jnp.float32, -bound, bound)
    return params


def encoder_reference(x, params):
    h = x
    for i in (1, 2, 3):
        h = h @ params[f"w{i}"] + params[f"b{i}"].reshape(1, -1)
        h = h * jax.nn.sigmoid(h)
    return h


if __name__ == "__main__":
    # NOTE: this is a small correctness harness only.  Do NOT tune/benchmark at
    # this size (pure per-step overhead); use B in the tens of thousands and
    # sweep block_b for real measurements.
    key = jax.random.PRNGKey(0)
    k_x, k_p = jax.random.split(key)

    batch = 300           # non-multiple of the tile -> exercises padding + slice
    input_size = 32
    encode_size = 16
    block_b = 128         # 3 grid steps: exercises the pipelined batch grid

    x = jax.random.normal(k_x, (batch, input_size), jnp.float32)
    params = init_encoder_params(k_p, input_size, encode_size)

    fwd = jax.jit(functools.partial(encoder_forward, block_b=block_b))
    out = jax.block_until_ready(fwd(x, params))

    # Correctness vs. pure-JAX f32 reference (bf16 MXU operands + approx
    # reciprocal in SiLU -> loosened tolerance).
    ref = encoder_reference(x, params)
    assert out.shape == (batch, encode_size)
    assert jnp.allclose(out, ref, atol=3e-2, rtol=3e-2), \
        float(jnp.max(jnp.abs(out - ref)))

    print("KERNEL_OK")
</pallas_src>

<mosaic_0001>
module attributes {stable_mosaic.version = 11 : i64} {
  func.func @encoder_kernel(%arg0: i32, %arg1: memref<32x128xf32, #tpu.memory_space<vmem>>, %arg2: memref<128x32xbf16, #tpu.memory_space<vmem>>, %arg3: memref<128x1xf32, #tpu.memory_space<vmem>>, %arg4: memref<32x128xbf16, #tpu.memory_space<vmem>>, %arg5: memref<32x1xf32, #tpu.memory_space<vmem>>, %arg6: memref<16x32xbf16, #tpu.memory_space<vmem>>, %arg7: memref<16x1xf32, #tpu.memory_space<vmem>>, %arg8: memref<16x128xf32, #tpu.memory_space<vmem>>) attributes {dimension_semantics = [#tpu.dimension_semantics<parallel>], iteration_bounds = array<i64: 3>, scalar_prefetch = 0 : i64, scratch_operands = 0 : i64, tpu.core_type = #tpu.core_type<tc>, window_params = [{transform_indices = @transform_0, window_bounds = array<i64: 32, 128>}, {pipeline_mode = #tpu.pipeline_mode<synchronous>, transform_indices = @transform_1, window_bounds = array<i64: 128, 32>}, {pipeline_mode = #tpu.pipeline_mode<synchronous>, transform_indices = @transform_2, window_bounds = array<i64: 128, 1>}, {pipeline_mode = #tpu.pipeline_mode<synchronous>, transform_indices = @transform_3, window_bounds = array<i64: 32, 128>}, {pipeline_mode = #tpu.pipeline_mode<synchronous>, transform_indices = @transform_4, window_bounds = array<i64: 32, 1>}, {pipeline_mode = #tpu.pipeline_mode<synchronous>, transform_indices = @transform_5, window_bounds = array<i64: 16, 32>}, {pipeline_mode = #tpu.pipeline_mode<synchronous>, transform_indices = @transform_6, window_bounds = array<i64: 16, 1>}, {transform_indices = @transform_7, window_bounds = array<i64: 16, 128>}]} {
    %c0 = arith.constant 0 : index
    %c0_0 = arith.constant 0 : index
    %0 = vector.load %arg1[%c0, %c0_0] : memref<32x128xf32, #tpu.memory_space<vmem>>, vector<32x128xf32>
    %1 = arith.truncf %0 : vector<32x128xf32> to vector<32x128xbf16>
    %c0_1 = arith.constant 0 : index
    %c0_2 = arith.constant 0 : index
    %2 = vector.load %arg2[%c0_1, %c0_2] : memref<128x32xbf16, #tpu.memory_space<vmem>>, vector<128x32xbf16>
    %cst = arith.constant dense<0.000000e+00> : vector<128x128xf32>
    %3 = tpu.matmul %2, %1, %cst {dimension_numbers = #tpu.dot_dimension_numbers<[1], [0], [0], [1], [0, 0, 1, 1], [], []>} : vector<128x32xbf16>, vector<32x128xbf16>, vector<128x128xf32> -> vector<128x128xf32>
    %c0_3 = arith.constant 0 : index
    %c0_4 = arith.constant 0 : index
    %4 = vector.load %arg3[%c0_3, %c0_4] : memref<128x1xf32, #tpu.memory_space<vmem>>, vector<128x1xf32>
    %5 = vector.broadcast %4 : vector<128x1xf32> to vector<128x128xf32>
    %6 = arith.addf %3, %5 : vector<128x128xf32>
    %cst_5 = arith.constant 0.000000e+00 : f32
    %7 = vector.broadcast %cst_5 : f32 to vector<128x128xf32>
    %8 = arith.subf %7, %6 : vector<128x128xf32>
    %9 = math.exp %8 : vector<128x128xf32>
    %cst_6 = arith.constant 1.000000e+00 : f32
    %10 = vector.broadcast %cst_6 : f32 to vector<128x128xf32>
    %11 = arith.addf %10, %9 : vector<128x128xf32>
    %12 = tpu.reciprocal %11 {approx = true} : vector<128x128xf32> -> vector<128x128xf32>
    %13 = arith.mulf %6, %12 : vector<128x128xf32>
    %c0_7 = arith.constant 0 : index
    %c0_8 = arith.constant 0 : index
    %14 = vector.load %arg4[%c0_7, %c0_8] : memref<32x128xbf16, #tpu.memory_space<vmem>>, vector<32x128xbf16>
    %15 = arith.truncf %13 : vector<128x128xf32> to vector<128x128xbf16>
    %cst_9 = arith.constant dense<0.000000e+00> : vector<32x128xf32>
    %16 = tpu.matmul %14, %15, %cst_9 {dimension_numbers = #tpu.dot_dimension_numbers<[1], [0], [0], [1], [0, 0, 1, 1], [], []>} : vector<32x128xbf16>, vector<128x128xbf16>, vector<32x128xf32> -> vector<32x128xf32>
    %c0_10 = arith.constant 0 : index
    %c0_11 = arith.constant 0 : index
    %17 = vector.load %arg5[%c0_10, %c0_11] : memref<32x1xf32, #tpu.memory_space<vmem>>, vector<32x1xf32>
    %18 = vector.broadcast %17 : vector<32x1xf32> to vector<32x128xf32>
    %19 = arith.addf %16, %18 : vector<32x128xf32>
    %cst_12 = arith.constant 0.000000e+00 : f32
    %20 = vector.broadcast %cst_12 : f32 to vector<32x128xf32>
    %21 = arith.subf %20, %19 : vector<32x128xf32>
    %22 = math.exp %21 : vector<32x128xf32>
    %cst_13 = arith.constant 1.000000e+00 : f32
    %23 = vector.broadcast %cst_13 : f32 to vector<32x128xf32>
    %24 = arith.addf %23, %22 : vector<32x128xf32>
    %25 = tpu.reciprocal %24 {approx = true} : vector<32x128xf32> -> vector<32x128xf32>
    %26 = arith.mulf %19, %25 : vector<32x128xf32>
    %c0_14 = arith.constant 0 : index
    %c0_15 = arith.constant 0 : index
    %27 = vector.load %arg6[%c0_14, %c0_15] : memref<16x32xbf16, #tpu.memory_space<vmem>>, vector<16x32xbf16>
    %28 = arith.truncf %26 : vector<32x128xf32> to vector<32x128xbf16>
    %cst_16 = arith.constant dense<0.000000e+00> : vector<16x128xf32>
    %29 = tpu.matmul %27, %28, %cst_16 {dimension_numbers = #tpu.dot_dimension_numbers<[1], [0], [0], [1], [0, 0, 1, 1], [], []>} : vector<16x32xbf16>, vector<32x128xbf16>, vector<16x128xf32> -> vector<16x128xf32>
    %c0_17 = arith.constant 0 : index
    %c0_18 = arith.constant 0 : index
    %30 = vector.load %arg7[%c0_17, %c0_18] : memref<16x1xf32, #tpu.memory_space<vmem>>, vector<16x1xf32>
    %31 = vector.broadcast %30 : vector<16x1xf32> to vector<16x128xf32>
    %32 = arith.addf %29, %31 : vector<16x128xf32>
    %cst_19 = arith.constant 0.000000e+00 : f32
    %33 = vector.broadcast %cst_19 : f32 to vector<16x128xf32>
    %34 = arith.subf %33, %32 : vector<16x128xf32>
    %35 = math.exp %34 : vector<16x128xf32>
    %cst_20 = arith.constant 1.000000e+00 : f32
    %36 = vector.broadcast %cst_20 : f32 to vector<16x128xf32>
    %37 = arith.addf %36, %35 : vector<16x128xf32>
    %38 = tpu.reciprocal %37 {approx = true} : vector<16x128xf32> -> vector<16x128xf32>
    %39 = arith.mulf %32, %38 : vector<16x128xf32>
    %c0_21 = arith.constant 0 : index
    %c0_22 = arith.constant 0 : index
    %40 = vector.load %arg8[%c0_21, %c0_22] : memref<16x128xf32, #tpu.memory_space<vmem>>, vector<16x128xf32>
    tpu.vector_store %arg8[%c0_21, %c0_22], %39 {strides = array<i32>} : memref<16x128xf32, #tpu.memory_space<vmem>>, vector<16x128xf32>,
    return
  }
  func.func @transform_0(%arg0: i32) -> (i32, i32) {
    %c0_i32 = arith.constant 0 : i32
    %c0_i32_0 = arith.constant 0 : i32
    return %c0_i32, %arg0 : i32, i32
  }
  func.func @transform_1(%arg0: i32) -> (i32, i32) {
    %c0_i32 = arith.constant 0 : i32
    %c0_i32_0 = arith.constant 0 : i32
    %c0_i32_1 = arith.constant 0 : i32
    return %c0_i32, %c0_i32_0 : i32, i32
  }
  func.func @transform_2(%arg0: i32) -> (i32, i32) {
    %c0_i32 = arith.constant 0 : i32
    %c0_i32_0 = arith.constant 0 : i32
    %c0_i32_1 = arith.constant 0 : i32
    return %c0_i32, %c0_i32_0 : i32, i32
  }
  func.func @transform_3(%arg0: i32) -> (i32, i32) {
    %c0_i32 = arith.constant 0 : i32
    %c0_i32_0 = arith.constant 0 : i32
    %c0_i32_1 = arith.constant 0 : i32
    return %c0_i32, %c0_i32_0 : i32, i32
  }
  func.func @transform_4(%arg0: i32) -> (i32, i32) {
    %c0_i32 = arith.constant 0 : i32
    %c0_i32_0 = arith.constant 0 : i32
    %c0_i32_1 = arith.constant 0 : i32
    return %c0_i32, %c0_i32_0 : i32, i32
  }
  func.func @transform_5(%arg0: i32) -> (i32, i32) {
    %c0_i32 = arith.constant 0 : i32
    %c0_i32_0 = arith.constant 0 : i32
    %c0_i32_1 = arith.constant 0 : i32
    return %c0_i32, %c0_i32_0 : i32, i32
  }
  func.func @transform_6(%arg0: i32) -> (i32, i32) {
    %c0_i32 = arith.constant 0 : i32
    %c0_i32_0 = arith.constant 0 : i32
    %c0_i32_1 = arith.constant 0 : i32
    return %c0_i32, %c0_i32_0 : i32, i32
  }
  func.func @transform_7(%arg0: i32) -> (i32, i32) {
    %c0_i32 = arith.constant 0 : i32
    %c0_i32_0 = arith.constant 0 : i32
    return %c0_i32, %arg0 : i32, i32
  }
}

</mosaic_0001>

<bundles_post_ra>
// kernel: encoder_forward.1
= control target key start
LH: loop header
LB: loop body
LE: loop exit
PB: predicated region body
PF: predicated region fallthrough
CT: control target
= control target key end

     0   :  { %12 = vsyncpa [#allocation4], 0  ;;  %s1475_s0 = inlined_call_operand.vmem [shape: f32[32,384], index: 0, kind: input, shape index: {}]   ;;  %s1476_s1 = inlined_call_operand.vmem [shape: bf16[128,32], index: 1, kind: input, shape index: {}]   ;;  %s1477_s2 = inlined_call_operand.vmem [shape: f32[128,1], index: 2, kind: input, shape index: {}]   ;;  %s1478_s3 = inlined_call_operand.vmem [shape: bf16[32,128], index: 3, kind: input, shape index: {}]   ;;  %s1479_s4 = inlined_call_operand.vmem [shape: f32[32,1], index: 4, kind: input, shape index: {}]   ;;  %s1480_s5 = inlined_call_operand.vmem [shape: bf16[16,32], index: 5, kind: input, shape index: {}]   ;;  %s1481_s6 = inlined_call_operand.vmem [shape: f32[16,1], index: 6, kind: input, shape index: {}]   ;;  %s1482_s7 = inlined_call_operand.hbm [shape: f32[16,384], index: 7, kind: output, shape index: {}]  }
   0x1   :  { %14 = vsyncpa [#allocation4 + $0x1], 0  ;;  %s1199_s24 = smov 0   ;;  %s1201_s25 = smov 0  }
   0x2   :  { %s1203_s26 = smov 0   ;;  %s1205_s27 = smov 0  }
   0x3 LB: > { %s878_s28 = sadd.s32 4294967295, %s1153_s27   ;;  %s879_s29 = sadd.s32 4294967294, %s1153_s27   ;;  %s1153_s27 = sphi %s1205_s27, %s1488_s27   ;;  %s1149_s26 = sphi %s1203_s26, %s1487_s26   ;;  %s1145_s25 = sphi %s1201_s25, %s1486_s25   ;;  %s1141_s24 = sphi %s1199_s24, %s1485_s24  }
   0x4   : > { %s1222_s30 = sadd.s32 1, %s1153_s27   ;;  %s27_s8 = sadd.s32 1, %s1149_s26 }
   0x5   : > { %s24_s9 = ssub.s32 %s1153_s27, %s1222_s30  ;;  %p34_p0 = scmp.ne.s32.totalorder %s1149_s26, %s1145_s25 }
   0x6   : > { %p25_p1 = scmp.eq.s32.totalorder %s24_s9, 0  ;;  %p35_p2 = scmp.eq.s32.totalorder %s1153_s27, 0 }
   0x7   : > { %p190_p3 = scmp.eq.s32.totalorder %s878_s28, 2  ;;  %p195_p4 = scmp.ne.s32.totalorder %s1145_s25, %s1141_s24 }
   0x8   : > { %s1235_s10 = scalar_select %p25_p1, %s1149_s26, %s27_s8  }
   0x9   : > { %p36_p5 = por %p35_p2, %p34_p0  ;;  %p1237_p6 = por %p190_p3, %p34_p0 }
   0xa   : > { %p196_p7 = scmp.eq.s32.totalorder %s879_s29, 2  ;;  %p881_p9 = scmp.ge.s32.totalorder %s1153_s27, 3 }
   0xc   : > { %p1241_p8 = por %p196_p7, %p195_p4  ;;  %230 = sbr.rel (%p881_p9) target bundleno = 25 (0x19), region = 40 }
  0x11   : > { %233 = sbr.rel (!%p36_p5) target bundleno = 25 (0x19), region = 44  ;;  %s235_s13 = sand.u32 (%p36_p5), 1, %s1149_s26  }
  0x12   : > { %s883_s14 = sshll.u32 (%p36_p5), %s1153_s27, 3  ;;  %s882_s15 = sshll.u32 (%p36_p5), %s235_s13, 5 }
  0x13   : > { %s239_s18 = scalar_lea.vmem (%p36_p5), %s1475_s0, %s883_s14  ;;  %s237_s19 = scalar_lea.vmem (%p36_p5), [#allocation2], %s882_s15 }
  0x14   : > { %v274_v0 = vld [vmem:[%s239_s18] sm:$0xff] (%p36_p5)  ;;  %v276_v1 = vld [vmem:[%s239_s18 + $0x18] sm:$0xff] (%p36_p5)  ;;  %v278_v2 = vld [vmem:[%s239_s18 + $0x30] sm:$0xff] (%p36_p5) }
  0x15   : > { %275 = vst [vmem:[%s237_s19] sm:$0xff] (%p36_p5), %v274_v0  ;;  %v280_v3 = vld [vmem:[%s239_s18 + $0x48] sm:$0xff] (%p36_p5) }
  0x16   : > { %277 = vst [vmem:[%s237_s19 + $0x8] sm:$0xff] %v276_v1 }
  0x17   : > { %279 = vst [vmem:[%s237_s19 + $0x10] sm:$0xff] %v278_v2 }
  0x18   : > { %281 = vst [vmem:[%s237_s19 + $0x18] sm:$0xff] %v280_v3 }
  0x19 PF: > { %p884_p10 = scmp.ge.s32.totalorder %s1153_s27, 1  ;;  %p286_p11 = scmp.lt.s32.totalorder %s1153_s27, 4 }
  0x1b   : > { %p287_p12 = pnand %p884_p10, %p286_p11 }
  0x1c   : > { %s1257_s22 = sand.u32 (!%p287_p12), 1, %s1145_s25   ;;  %s941_s8 = sshll.u32 (!%p287_p12), %s878_s28, 3 }
  0x1d   : > { %290 = sbr.rel (%p287_p12) target bundleno = 644 (0x284), region = 82  ;;  %s885_s23 = sshll.u32 (!%p287_p12), %s1257_s22, 5 }
  0x1e   : > { %s295_s14 = scalar_lea.vmem (!%p287_p12), [#allocation2], %s885_s23  ;;  %s886_s29 = sshll.u32 (!%p287_p12), %s1257_s22, 4 }
  0x1f   : > { %s323_s15 = scalar_lea.vmem (!%p287_p12), [#allocation3], %s886_s29  ;;  %s797_s18 = scalar_lea.sflag (!%p287_p12), [#allocation4], %s1257_s22 }
  0x20   : > { %s808_s16 = sshll.u32 (!%p287_p12), %s323_s15, 4  ;;  %s1111_s23 = scalar_lea.hbm (!%p287_p12), %s1482_s7, 48  ;;  %s809_s16 = int_to_ptr.vmem [resolvable:$true] %s808_s16 }
  0x22   : > { %v361_v4 = vld [vmem:[%s1477_s2 + $0x70] sm:$0xff]  ;;  %v1155_v5 = vmov 0   ;;  %v359_v6 = vld [vmem:[%s1477_s2 + $0x60] sm:$0xff]  ;;  %v328_v9 = vld [vmem:[%s295_s14 + $0x18] sm:$0xff]  ;;  %vm483_vm0 = vcmask 261120  }
  0x23   : > { %1000 = vset.pattern.permute.xlu0 %v1155_v5  ;;  %1001 = vset.pattern.permute.xlu1 %v1155_v5  ;;  %v357_v7 = vld [vmem:[%s1477_s2 + $0x50] sm:$0xff]  ;;  %v325_v10 = vld [vmem:[%s295_s14] sm:$0xff]  ;;  %v326_v12 = vld [vmem:[%s295_s14 + $0x8] sm:$0xff] }
  0x24   : > { %435 = vperm.xlu0 %1000, %v361_v4   ;;  %425 = vperm.xlu1 %1001, %v359_v6   ;;  %v327_v8 = vld [vmem:[%s295_s14 + $0x10] sm:$0xff]  ;;  %v329_v13 = vpack.c.bf16 %v326_v12, %v325_v10  ;;  %v362_v14 = vld [vmem:[%s1477_s2 + $0x78] sm:$0xff]  ;;  %v360_v15 = vld [vmem:[%s1477_s2 + $0x68] sm:$0xff]  ;;  %s807_s14 = scalar_lea.hbm %s1482_s7, %s941_s8 }
  0x25   : > { %1002 = vset.pattern.permute.xlu2 %v1155_v5  ;;  %v330_v11 = vpack.c.bf16 %v328_v9, %v327_v8  ;;  %v944_v16 = vld [vmem:[%s1476_s1] sm:$0xff]  ;;  %v358_v17 = vld [vmem:[%s1477_s2 + $0x58] sm:$0xff]  ;;  %v356_v20 = vld [vmem:[%s1477_s2 + $0x48] sm:$0xff]  ;;  %s810_s17 = sshll.u32 %s807_s14, 4  ;;  %s811_s17 = int_to_ptr.hbm [resolvable:$true] %s810_s17 }
  0x26   : > { %415 = vperm.xlu2 %1002, %v357_v7   ;;  %v948_v18 = vld [vmem:[%s1476_s1 + $0x20] sm:$0xff]  ;;  %v353_v21 = vld [vmem:[%s1477_s2 + $0x30] sm:$0xff]  ;;  %v354_v22 = vld [vmem:[%s1477_s2 + $0x38] sm:$0xff]  ;;  %s1105_s28 = sshra.s32 %s811_s17, 4  ;;  %s1106_s28 = int_to_ptr.hbm [resolvable:$true] %s1105_s28 }
  0x27   : > { %514 = vmatpush.bf16.msra.mxu0 %v330_v11  ;;  %955 = vmatpush.bf16.msra.mxu3 %v330_v11  ;;  %v355_v19 = vld [vmem:[%s1477_s2 + $0x40] sm:$0xff]  ;;  %v945_v24 = vld [vmem:[%s1476_s1 + $0x8] sm:$0xff]  ;;  %v349_v27 = vld [vmem:[%s1477_s2 + $0x10] sm:$0xff]  ;;  %s1107_s19 = scalar_lea.hbm %s1106_s28, 16  ;;  %p1112_p2 = scmp.lt.s32.totalorder %s1106_s28, %s1482_s7 }
  0x28   : > { %v351_v23 = vld [vmem:[%s1477_s2 + $0x20] sm:$0xff]  ;;  %v352_v25 = vld [vmem:[%s1477_s2 + $0x28] sm:$0xff]  ;;  %v350_v28 = vld [vmem:[%s1477_s2 + $0x18] sm:$0xff]  ;;  %p1108_p13 = scmp.ne.s32.totalorder %s1106_s28, %s1107_s19  ;;  %p1113_p3 = scmp.lt.s32.totalorder %s1111_s23, %s1107_s19 }
  0x29   : > { %v949_v26 = vld [vmem:[%s1476_s1 + $0x28] sm:$0xff]  ;;  %v347_v29 = vld [vmem:[%s1477_s2] sm:$0xff]  ;;  %v667_v31 = vld [vmem:[%s1479_s4 + $0x10] sm:$0xff] }
  0x2a   : > { %v348_v30 = vld [vmem:[%s1477_s2 + $0x8] sm:$0xff]  ;;  %v946_v32 = vld [vmem:[%s1476_s1 + $0x10] sm:$0xff]  ;;  %v668_v33 = vld [vmem:[%s1479_s4 + $0x18] sm:$0xff]  ;;  %p1109_p0 = pnand %p1108_p13, %p1237_p6  ;;  %p1114_p4 = por %p1113_p3, %p1112_p2 }
  0x2b   : > { %515 = vmatpush.bf16.msra.mxu0 %v329_v13  ;;  %956 = vmatpush.bf16.msra.mxu3 %v329_v13  ;;  %v950_v34 = vld [vmem:[%s1476_s1 + $0x30] sm:$0xff]  ;;  %v665_v35 = vld [vmem:[%s1479_s4] sm:$0xff]  ;;  %v666_v36 = vld [vmem:[%s1479_s4 + $0x8] sm:$0xff] }
  0x2c   : > { %440 = vperm.xlu0 %1000, %v362_v14   ;;  %430 = vperm.xlu1 %1001, %v360_v15   ;;  %v748_v37 = vld [vmem:[%s1481_s6] sm:$0xff]  ;;  %v749_v38 = vld [vmem:[%s1481_s6 + $0x8] sm:$0xff]  ;;  %v947_v39 = vld [vmem:[%s1476_s1 + $0x18] sm:$0xff]  ;;  %p1110_p1 = pneg %p1109_p0 }
  0x2d   : > { %v951_v40 = vld [vmem:[%s1476_s1 + $0x38] sm:$0xff] }
  0x2e   : > { %420 = vperm.xlu2 %1002, %v358_v17   ;;  %919 = vmatmul.msk.bf16.vlgmr.msra.gmra.mxu0 %vm483_vm0, %v944_v16  ;;  %p1115_p5 = pnand %p1114_p4, %p1110_p1 }
  0x2f   : > { %923 = vmatmul.msk.bf16.vlgmr.msra.gmra.mxu3 %vm483_vm0, %v948_v18 }
  0x34   : > { %405 = vperm.xlu0 %1000, %v355_v19   ;;  %410 = vperm.xlu1 %1001, %v356_v20  }
  0x36   : > { %395 = vperm.xlu2 %1002, %v353_v21  }
  0x3c   : > { %400 = vperm.xlu0 %1000, %v354_v22   ;;  %385 = vperm.xlu1 %1001, %v351_v23  }
  0x3e   : > { %390 = vperm.xlu2 %1002, %v352_v25   ;;  %920 = vmatmul.msk.bf16.gmra.mxu0 %vm483_vm0, %v945_v24 }
  0x3f   : > { %924 = vmatmul.msk.bf16.gmra.mxu3 %vm483_vm0, %v949_v26 }
  0x44   : > { %375 = vperm.xlu0 %1000, %v349_v27   ;;  %380 = vperm.xlu1 %1001, %v350_v28  }
  0x46   : > { %365 = vperm.xlu2 %1002, %v347_v29  }
  0x4c   : > { %370 = vperm.xlu0 %1000, %v348_v30   ;;  %681 = vperm.xlu1 %1001, %v667_v31  }
  0x4e   : > { %686 = vperm.xlu2 %1002, %v668_v33   ;;  %921 = vmatmul.msk.bf16.gmra.mxu0 %vm483_vm0, %v946_v32 }
  0x4f   : > { %925 = vmatmul.msk.bf16.gmra.mxu3 %vm483_vm0, %v950_v34 }
  0x54   : > { %671 = vperm.xlu0 %1000, %v665_v35   ;;  %676 = vperm.xlu1 %1001, %v666_v36  }
  0x56   : > { %752 = vperm.xlu2 %1002, %v748_v37  }
  0x5c   : > { %757 = vperm.xlu0 %1000, %v749_v38  }
  0x5e   : > { %922 = vmatmul.msk.bf16.gmra.mxu0 %vm483_vm0, %v947_v39 }
  0x5f   : > { %926 = vmatmul.msk.bf16.gmra.mxu3 %vm483_vm0, %v951_v40 }
  0x80   : > { %v416_v53 = vpop.permute.xlu2 %415 }
  0x88   : > { %v421_v58 = vpop.permute.xlu2 %420 }
  0x90   : > { %v396_v4 = vpop.permute.xlu2 %395 }
  0x96   : > { %v436_v48 = vpop.permute.xlu0 %435  ;;  %v426_v49 = vpop.permute.xlu1 %425 }
  0x98   : > { %v391_v25 = vpop.permute.xlu2 %390 }
  0x9e   : > { %v441_v52 = vpop.permute.xlu0 %440  ;;  %v431_v55 = vpop.permute.xlu1 %430 }
  0xa6   : > { %v406_v57 = vpop.permute.xlu0 %405  ;;  %v411_v60 = vpop.permute.xlu1 %410 }
  0xab   : > { %v1355_v41 = vpop.f32.mrf.mxu0 }
  0xae   : > { %v401_v63 = vpop.permute.xlu0 %400  ;;  %v386_v11 = vpop.permute.xlu1 %385 }
  0xb2   : > { %v537_v42 = vpop.f32.mrf.mxu3 }
  0xb3   : > { %v1357_v43 = vpop.f32.mrf.mxu0  ;;  %v1379_v14 = vadd.f32 %v537_v42, %v406_v57 }
  0xb5   : > { %v565_v26 = vsub.f32 0.0, %v1379_v14 }
  0xb6   : > { %v376_v20 = vpop.permute.xlu0 %375  ;;  %v381_v36 = vpop.permute.xlu1 %380 }
  0xb7   : > { %v589_v35 = vmul.f32 1.442695, %v565_v26 }
  0xba   : > { %v539_v44 = vpop.f32.mrf.mxu3 }
  0xbb   : > { %v1359_v45 = vpop.f32.mrf.mxu0  ;;  %v1377_v13 = vadd.f32 %v539_v44, %v411_v60 }
  0xbd   : > { %v566_v22 = vsub.f32 0.0, %v1377_v13 }
  0xbf   : > { %v591_v32 = vmul.f32 1.442695, %v566_v22 }
  0xc2   : > { %v542_v46 = vpop.f32.mrf.mxu3 }
  0xc3   : > { %v1361_v47 = vpop.f32.mrf.mxu0  ;;  %v1373_v8 = vadd.f32 %v542_v46, %v416_v53  ;;  %v1402_v53 = vadd.f32 %v1359_v45, %v376_v20 }
  0xc4   : > { %v1398_v44 = vadd.f32 %v1361_v47, %v381_v36 }
  0xc5   : > { %v567_v17 = vsub.f32 0.0, %v1373_v8 }
  0xc7   : > { %v593_v27 = vmul.f32 1.442695, %v567_v17 }
  0xca   : > { %v544_v50 = vpop.f32.mrf.mxu3 }
  0xcb   : > { %v527_v51 = vpop.f32.mrf.mxu0  ;;  %v1370_v5 = vadd.f32 %v544_v50, %v421_v58  ;;  %v371_v50 = vpop.permute.xlu0 %370 }
  0xcc   : > { %v1394_v37 = vadd.f32 %v527_v51, %v386_v11  ;;  %v1406_v58 = vadd.f32 %v1357_v43, %v371_v50 }
  0xcd   : > { %v568_v12 = vsub.f32 0.0, %v1370_v5 }
  0xce   : > { %v561_v51 = vsub.f32 0.0, %v1394_v37  ;;  %v558_v43 = vsub.f32 0.0, %v1406_v58 }
  0xcf   : > { %v595_v21 = vmul.f32 1.442695, %v568_v12 }
  0xd0   : > { %v575_v20 = vmul.f32 1.442695, %v558_v43 }
  0xd2   : > { %v547_v54 = vpop.f32.mrf.mxu3 }
  0xd3   : > { %v529_v56 = vpop.f32.mrf.mxu0  ;;  %v1366_v2 = vadd.f32 %v547_v54, %v426_v49 }
  0xd4   : > { %v1391_v33 = vadd.f32 %v529_v56, %v391_v25 }
  0xd5   : > { %v569_v9 = vsub.f32 0.0, %v1366_v2 }
  0xd6   : > { %v562_v46 = vsub.f32 0.0, %v1391_v33 }
  0xd7   : > { %v597_v18 = vmul.f32 1.442695, %v569_v9 }
  0xd8   : > { %v583_v60 = vmul.f32 1.442695, %v562_v46 }
  0xda   : > { %v549_v59 = vpop.f32.mrf.mxu3 }
  0xdb   : > { %v1363_v61 = vadd.f32 %v549_v59, %v431_v55  ;;  %v532_v62 = vpop.f32.mrf.mxu0  ;;  %v366_v55 = vpop.permute.xlu2 %365  ;;  %v560_v59 = vsub.f32 0.0, %v1398_v44 }
  0xdc   : > { %v1389_v28 = vadd.f32 %v532_v62, %v396_v4 }
  0xdd   : > { %v570_v0 = vsub.f32 0.0, %v1363_v61  ;;  %v579_v9 = vmul.f32 1.442695, %v560_v59 }
  0xde   : > { %v563_v39 = vsub.f32 0.0, %v1389_v28 }
  0xdf   : > { %v599_v7 = vmul.f32 1.442695, %v570_v0  ;;  %v559_v0 = vsub.f32 0.0, %v1402_v53 }
  0xe0   : > { %v585_v54 = vmul.f32 1.442695, %v563_v39 }
  0xe1   : > { %1003 = vpow2.f32 %v599_v7 }
  0xe2   : > { %v552_v1 = vpop.f32.mrf.mxu3 }
  0xe3   : > { %v1368_v3 = vadd.f32 %v552_v1, %v436_v48  ;;  %v534_v15 = vpop.f32.mrf.mxu0  ;;  %v581_v1 = vmul.f32 1.442695, %v561_v51 }
  0xe4   : > { %v1385_v23 = vadd.f32 %v534_v15, %v401_v63  ;;  %v1410_v63 = vadd.f32 %v1355_v41, %v366_v55  ;;  %v577_v41 = vmul.f32 1.442695, %v559_v0 }
  0xe5   : > { %v571_v6 = vsub.f32 0.0, %v1368_v3 }
  0xe6   : > { %v564_v34 = vsub.f32 0.0, %v1385_v23  ;;  %v557_v15 = vsub.f32 0.0, %v1410_v63 }
  0xe7   : > { %v601_v10 = vmul.f32 1.442695, %v571_v6  ;;  %v1004_v30 = vpop.eup %1003 }
  0xe8   : > { %v618_v38 = vadd.f32 1.0, %v1004_v30  ;;  %v587_v48 = vmul.f32 1.442695, %v564_v34 }
  0xe9   : > { %1005 = vpow2.f32 %v601_v10 }
  0xea   : > { %v554_v16 = vpop.f32.mrf.mxu3  ;;  %1007 = vpow2.f32 %v597_v18 }
  0xeb   : > { %v1382_v19 = vadd.f32 %v554_v16, %v441_v52  ;;  %1009 = vpow2.f32 %v595_v21 }
  0xed   : > { %v572_v24 = vsub.f32 0.0, %v1382_v19 }
  0xef   : > { %v603_v29 = vmul.f32 1.442695, %v572_v24  ;;  %v1006_v31 = vpop.eup %1005 }
  0xf0   : > { %v619_v40 = vadd.f32 1.0, %v1006_v31  ;;  %v1008_v42 = vpop.eup %1007 }
  0xf1   : > { %1011 = vpow2.f32 %v603_v29  ;;  %v1010_v49 = vpop.eup %1009  ;;  %v617_v56 = vadd.f32 1.0, %v1008_v42 }
  0xf2   : > { %1013 = vpow2.f32 %v593_v27  ;;  %v616_v62 = vadd.f32 1.0, %v1010_v49  ;;  %v573_v27 = vmul.f32 1.442695, %v557_v15 }
  0xf3   : > { %1015 = vpow2.f32 %v591_v32 }
  0xf4   : > { %1017 = vpow2.f32 %v589_v35 }
  0xf5   : > { %1019 = vrcp.f32 %v618_v38 }
  0xf6   : > { %1021 = vrcp.f32 %v619_v40 }
  0xf7   : > { %v1012_v52 = vpop.eup %1011  ;;  %1023 = vpow2.f32 %v587_v48 }
  0xf8   : > { %v620_v57 = vadd.f32 1.0, %v1012_v52  ;;  %v1014_v47 = vpop.eup %1013 }
  0xf9   : > { %v1016_v45 = vpop.eup %1015  ;;  %v615_v6 = vadd.f32 1.0, %v1014_v47 }
  0xfa   : > { %1025 = vrcp.f32 %v620_v57  ;;  %v1018_v4 = vpop.eup %1017  ;;  %v614_v11 = vadd.f32 1.0, %v1016_v45 }
  0xfb   : > { %1027 = vpow2.f32 %v585_v54  ;;  %v1020_v7 = vpop.eup %1019  ;;  %v613_v17 = vadd.f32 1.0, %v1018_v4 }
  0xfc   : > { %1029 = vrcp.f32 %v617_v56  ;;  %v1022_v10 = vpop.eup %1021  ;;  %v650_v29 = vmul.f32 %v1020_v7, %v1363_v61 }
  0xfd   : > { %1031 = vpow2.f32 %v583_v60  ;;  %v1024_v12 = vpop.eup %1023  ;;  %v651_v21 = vmul.f32 %v1022_v10, %v1368_v3 }
  0xfe   : > { %1033 = vrcp.f32 %v616_v62  ;;  %v612_v25 = vadd.f32 1.0, %v1024_v12  ;;  %v682_v12 = vpop.permute.xlu1 %681 }
  0xff   : > { %1035 = vpow2.f32 %v581_v1 }
 0x100   : > { %v1026_v16 = vpop.eup %1025  ;;  %1037 = vrcp.f32 %v615_v6 }
 0x101   : > { %v1028_v18 = vpop.eup %1027  ;;  %1039 = vpow2.f32 %v579_v9  ;;  %v652_v22 = vmul.f32 %v1026_v16, %v1382_v19  ;;  %v672_v16 = vpop.permute.xlu0 %671 }
 0x102   : > { %v1030_v24 = vpop.eup %1029  ;;  %1041 = vrcp.f32 %v614_v11  ;;  %v611_v32 = vadd.f32 1.0, %v1028_v18 }
 0x103   : > { %v1032_v26 = vpop.eup %1031  ;;  %1043 = vpow2.f32 %v577_v41  ;;  %v664_v30 = vpack.c.bf16 %v652_v22, %v651_v21  ;;  %v649_v35 = vmul.f32 %v1030_v24, %v1366_v2 }
 0x104   : > { %v1034_v31 = vpop.eup %1033  ;;  %1045 = vrcp.f32 %v613_v17  ;;  %v610_v36 = vadd.f32 1.0, %v1032_v26  ;;  %v687_v26 = vpop.permute.xlu2 %686 }
 0x105   : > { %v1036_v34 = vpop.eup %1035  ;;  %1047 = vpow2.f32 %v575_v20  ;;  %701 = vmatpush.bf16.msra.mxu1 %v664_v30  ;;  %v648_v38 = vmul.f32 %v1034_v31, %v1370_v5  ;;  %v663_v39 = vpack.c.bf16 %v650_v29, %v649_v35 }
 0x106   : > { %v1038_v3 = vpop.eup %1037  ;;  %1049 = vrcp.f32 %v612_v25  ;;  %v609_v42 = vadd.f32 1.0, %v1036_v34 }
 0x107   : > { %v1040_v19 = vpop.eup %1039  ;;  %1051 = vpow2.f32 %v573_v27  ;;  %v647_v46 = vmul.f32 %v1038_v3, %v1373_v8 }
 0x108   : > { %v1042_v40 = vpop.eup %1041  ;;  %1053 = vrcp.f32 %v611_v32  ;;  %v608_v49 = vadd.f32 1.0, %v1040_v19 }
 0x109   : > { %v1044_v61 = vpop.eup %1043  ;;  %702 = vmatpush.bf16.msra.mxu1 %v663_v39  ;;  %1055 = vrcp.f32 %v610_v36  ;;  %v646_v50 = vmul.f32 %v1042_v40, %v1377_v13  ;;  %v662_v52 = vpack.c.bf16 %v648_v38, %v647_v46 }
 0x10a   : > { %v1046_v48 = vpop.eup %1045  ;;  %v607_v54 = vadd.f32 1.0, %v1044_v61  ;;  %1057 = vrcp.f32 %v609_v42 }
 0x10b   : > { %v1048_v2 = vpop.eup %1047  ;;  %v645_v5 = vmul.f32 %v1046_v48, %v1379_v14  ;;  %1059 = vrcp.f32 %v608_v49 }
 0x10c   : > { %v1050_v51 = vpop.eup %1049  ;;  %v606_v57 = vadd.f32 1.0, %v1048_v2  ;;  %1061 = vrcp.f32 %v607_v54 }
 0x10d   : > { %v1052_v55 = vpop.eup %1051  ;;  %703 = vmatpush.bf16.msra.mxu1 %v662_v52  ;;  %v644_v8 = vmul.f32 %v1050_v51, %v1385_v23  ;;  %v661_v47 = vpack.c.bf16 %v646_v50, %v645_v5  ;;  %v753_v5 = vpop.permute.xlu2 %752 }
 0x10e   : > { %v1054_v56 = vpop.eup %1053  ;;  %v605_v60 = vadd.f32 1.0, %v1052_v55  ;;  %1063 = vrcp.f32 %v606_v57  ;;  %v954_v55 = vld [vmem:[%s1480_s5] sm:$0xff] }
 0x10f   : > { %v1056_v59 = vpop.eup %1055  ;;  %v643_v62 = vmul.f32 %v1054_v56, %v1389_v28 }
 0x110   : > { %v1058_v13 = vpop.eup %1057  ;;  %v642_v45 = vmul.f32 %v1056_v59, %v1391_v33  ;;  %1065 = vrcp.f32 %v605_v60  ;;  %v758_v59 = vpop.permute.xlu0 %757 }
 0x111   : > { %704 = vmatpush.bf16.msra.mxu1 %v661_v47  ;;  %v660_v0 = vpack.c.bf16 %v644_v8, %v643_v62  ;;  %v1060_v1 = vpop.eup %1059  ;;  %v641_v14 = vmul.f32 %v1058_v13, %v1394_v37  ;;  %v952_v37 = vld [vmem:[%s1478_s3] sm:$0xff] }
 0x112   : > { %v1062_v4 = vpop.eup %1061  ;;  %v640_v23 = vmul.f32 %v1060_v1, %v1398_v44  ;;  %v953_v44 = vld [vmem:[%s1478_s3 + $0x8] sm:$0xff] }
 0x113   : > { %v659_v6 = vpack.c.bf16 %v642_v45, %v641_v14  ;;  %v639_v43 = vmul.f32 %v1062_v4, %v1402_v53 }
 0x114   : > { %v1064_v7 = vpop.eup %1063 }
 0x115   : > { %705 = vmatpush.bf16.msra.mxu1 %v660_v0  ;;  %v638_v9 = vmul.f32 %v1064_v7, %v1406_v58  ;;  %v658_v10 = vpack.c.bf16 %v640_v23, %v639_v43  ;;  %v677_v58 = vpop.permute.xlu1 %676 }
 0x116   : > { %v1066_v28 = vpop.eup %1065 }
 0x117   : > { %v637_v33 = vmul.f32 %v1066_v28, %v1410_v63 }
 0x119   : > { %706 = vmatpush.bf16.msra.mxu1 %v659_v6  ;;  %v657_v11 = vpack.c.bf16 %v638_v9, %v637_v33 }
 0x11d   : > { %707 = vmatpush.bf16.msra.mxu1 %v658_v10 }
 0x121   : > { %708 = vmatpush.bf16.msra.mxu1 %v657_v11 }
 0x124   : > { %709 = vmatmul.bf16.vlgmr.msra.gmra.mxu1 %v952_v37 }
 0x134   : > { %714 = vmatmul.bf16.gmra.mxu1 %v953_v44 }
 0x1a1   : > { %v710_v53 = vpop.f32.mrf.mxu1 }
 0x1a2   : > { %v711_v17 = vadd.f32 %v710_v53, %v672_v16 }
 0x1a4   : > { %v720_v22 = vsub.f32 0.0, %v711_v17 }
 0x1a6   : > { %v724_v29 = vmul.f32 1.442695, %v720_v22 }
 0x1a9   : > { %v712_v15 = vpop.f32.mrf.mxu1 }
 0x1aa   : > { %v713_v41 = vadd.f32 %v712_v15, %v677_v58 }
 0x1ac   : > { %v721_v20 = vsub.f32 0.0, %v713_v41 }
 0x1ae   : > { %v726_v25 = vmul.f32 1.442695, %v721_v20 }
 0x1b1   : > { %v715_v63 = vpop.f32.mrf.mxu1 }
 0x1b2   : > { %v716_v18 = vadd.f32 %v715_v63, %v682_v12 }
 0x1b4   : > { %v722_v21 = vsub.f32 0.0, %v716_v18 }
 0x1b6   : > { %v728_v24 = vmul.f32 1.442695, %v722_v21 }
 0x1b8   : > { %1067 = vpow2.f32 %v728_v24 }
 0x1b9   : > { %v717_v27 = vpop.f32.mrf.mxu1  ;;  %1069 = vpow2.f32 %v726_v25 }
 0x1ba   : > { %v718_v30 = vadd.f32 %v717_v27, %v687_v26  ;;  %1071 = vpow2.f32 %v724_v29 }
 0x1bc   : > { %v723_v31 = vsub.f32 0.0, %v718_v30 }
 0x1be   : > { %v730_v32 = vmul.f32 1.442695, %v723_v31  ;;  %v1068_v34 = vpop.eup %1067 }
 0x1bf   : > { %v1070_v35 = vpop.eup %1069  ;;  %v734_v3 = vadd.f32 1.0, %v1068_v34 }
 0x1c0   : > { %1073 = vpow2.f32 %v730_v32  ;;  %v1072_v36 = vpop.eup %1071  ;;  %v733_v19 = vadd.f32 1.0, %v1070_v35 }
 0x1c1   : > { %v732_v39 = vadd.f32 1.0, %v1072_v36  ;;  %1075 = vrcp.f32 %v734_v3 }
 0x1c2   : > { %1077 = vrcp.f32 %v733_v19 }
 0x1c6   : > { %v1074_v38 = vpop.eup %1073 }
 0x1c7   : > { %v735_v40 = vadd.f32 1.0, %v1074_v38  ;;  %v1076_v42 = vpop.eup %1075 }
 0x1c8   : > { %v1078_v61 = vpop.eup %1077  ;;  %v742_v48 = vmul.f32 %v1076_v42, %v716_v18 }
 0x1c9   : > { %1079 = vrcp.f32 %v735_v40  ;;  %v741_v50 = vmul.f32 %v1078_v61, %v713_v41 }
 0x1ca   : > { %1081 = vrcp.f32 %v732_v39 }
 0x1cf   : > { %v1080_v46 = vpop.eup %1079 }
 0x1d0   : > { %v743_v49 = vmul.f32 %v1080_v46, %v718_v30  ;;  %v1082_v2 = vpop.eup %1081 }
 0x1d1   : > { %v740_v51 = vmul.f32 %v1082_v2, %v711_v17 }
 0x1d2   : > { %v747_v52 = vpack.c.bf16 %v743_v49, %v742_v48 }
 0x1d3   : > { %v746_v54 = vpack.c.bf16 %v741_v50, %v740_v51 }
 0x1d4   : > { %774 = vmatpush.bf16.msra.mxu2 %v747_v52 }
 0x1d8   : > { %775 = vmatpush.bf16.msra.mxu2 %v746_v54 }
 0x1db   : > { %939 = vmatmul.msk.bf16.vlgmr.msra.gmra.mxu2 %vm483_vm0, %v954_v55 }
 0x25e   : > { %v777_v56 = vpop.f32.mrf.mxu2 }
 0x25f   : > { %v778_v57 = vadd.f32 %v777_v56, %v753_v5 }
 0x261   : > { %v782_v8 = vsub.f32 0.0, %v778_v57 }
 0x263   : > { %v784_v47 = vmul.f32 1.442695, %v782_v8 }
 0x265   : > { %1083 = vpow2.f32 %v784_v47 }
 0x266   : > { %v779_v60 = vpop.f32.mrf.mxu2 }
 0x267   : > { %v780_v62 = vadd.f32 %v779_v60, %v758_v59 }
 0x269   : > { %v783_v13 = vsub.f32 0.0, %v780_v62 }
 0x26b   : > { %v1084_v45 = vpop.eup %1083  ;;  %v786_v0 = vmul.f32 1.442695, %v783_v13 }
 0x26c   : > { %v788_v1 = vadd.f32 1.0, %v1084_v45 }
 0x26d   : > { %1085 = vpow2.f32 %v786_v0 }
 0x26e   : > { %1087 = vrcp.f32 %v788_v1 }
 0x273   : > { %v1086_v14 = vpop.eup %1085 }
 0x274   : > { %v1088_v4 = vpop.eup %1087  ;;  %v789_v23 = vadd.f32 1.0, %v1086_v14 }
 0x275   : > { %v792_v6 = vmul.f32 %v1088_v4, %v778_v57 }
 0x276   : > { %1089 = vrcp.f32 %v789_v23 }
 0x277   : > { %794 = vst [vmem:[%s323_s15] sm:$0xff] %v792_v6 }
 0x27c   : > { %v1090_v7 = vpop.eup %1089 }
 0x27d   : > { %v793_v43 = vmul.f32 %v1090_v7, %v780_v62 }
 0x27f   : > { %795 = vst [vmem:[%s323_s15 + $0x8] sm:$0xff] %v793_v43 }
 0x280   : > { %1118 = shalt.err (!%p1115_p5)
}
 0x281   : > { %s1156_s22 = smov 128   ;;  %s1157_s9 = smov 384  }
 0x282   : > { %s1158_s13 = smov 8  }
 0x283   : > { %957 = dma.vmem_to_hbm [thread:$0]  (%p1237_p6), %s809_s16, 256, %s811_s17, %s797_s18, %s1156_s22, %s1157_s9, %s1158_s13  }
 0x284 PF: > { %p963_p7 = scmp.ge.s32.totalorder %s1153_s27, 2  ;;  %s825_s14 = sand.u32 1, %s1141_s24  }
 0x285   : > { %s826_s15 = scalar_lea.sflag [#allocation4], %s825_s14 }
 0x286   : > { %p960_p9 = pnand %p963_p7, %p1241_p8 }
 0x288   : > { %p961_p10 = pneg %p960_p9 }
 0x28a   : > { %1136 = dma.done.wait (%p961_p10), %s826_s15, 256  }
 0x28b   : > { %1138 = vsyncadd (%p961_p10), %s826_s15, 4294967040  ;;  %p17_p11 = scmp.ge.s32.totalorder %s1222_s30, 5   ;;  %s1485_s24 = smov %s1145_s25 }
 0x28c   : > { %s1486_s25 = smov %s1149_s26  ;;  %s1487_s26 = smov %s1235_s10 }
 0x28d   : > { %s1488_s27 = smov %s1222_s30  ;;  %19 = sbr.rel (!%p17_p11) target bundleno = 3 (0x3), region = 126 }
 0x292   :  { %832 = vsyncpa [#allocation4], 1 }
 0x293   :  { %834 = vsyncpa [#allocation4 + $0x1], 1 }

</bundles_post_ra>
